<compile_context>
chip_gen: v7x
topology: tpu7x:2x2x1
jax: 0.10.0
libtpu: 0.0.40
codegen_flags: <defaults>
</compile_context>

<pallas_src>
import functools
import math

import jax
import jax.numpy as jnp
from jax import lax
from jax.experimental import pallas as pl
from jax.experimental.pallas import tpu as pltpu


# ----------------------------------------------------------------------------
# Pallas kernel: inverse-homography warp + exp(ps * init_map) bilinear resample
# ----------------------------------------------------------------------------
def _warp_kernel(params_ref, out_ref, *, H, W, RL):
    # params_ref: SMEM (B*11,) -- per batch: [m00..m22 (row-major M^-1),
    #                                         -ps/H, exp(-ps/H)]
    # out_ref:    VMEM (1, 1, THG, L) block, L = RL*W lanes (RL image rows
    #             folded into the lane axis), THG row-groups on sublanes.
    b = pl.program_id(0)
    g = pl.program_id(1)
    thg = out_ref.shape[2]
    L = out_ref.shape[3]

    base = b * 11
    m00 = params_ref[base + 0]
    m01 = params_ref[base + 1]
    m02 = params_ref[base + 2]
    m10 = params_ref[base + 3]
    m11 = params_ref[base + 4]
    m12 = params_ref[base + 5]
    m20 = params_ref[base + 6]
    m21 = params_ref[base + 7]
    m22 = params_ref[base + 8]
    np_over_h = params_ref[base + 9]   # -ps / H
    c_step = params_ref[base + 10]     # exp(-ps / H)

    fW = float(W)
    fH = float(H)
    fRL = float(RL)

    # Lane decomposition: lane l -> (dy, x) with l = dy*W + x, dy in [0, RL).
    # Exact for these small integers (true division of representable ints).
    l_f = lax.broadcasted_iota(jnp.int32, (1, L), 1).astype(jnp.float32)
    dy_f = jnp.floor(l_f / fW)                     # (1, L) per-lane row offset
    x_f = l_f - dy_f * fW                          # (1, L) per-lane column

    # Row-group base y (column vector over sublanes).
    yb_f = (lax.broadcasted_iota(jnp.int32, (thg, 1), 0)
            + g * thg).astype(jnp.float32) * fRL   # (thg, 1)

    # Separable projective terms: full y = yb + dy, so
    #   num_x = m00*x + m01*y + m02 = (m00*x + m01*dy) + (m01*yb + m02), etc.
    ax = m00 * x_f + m01 * dy_f                    # (1, L)
    bx = m10 * x_f + m11 * dy_f
    dx = m20 * x_f + m21 * dy_f
    ay = m01 * yb_f + m02                          # (thg, 1)
    by = m11 * yb_f + m12
    dyc = m21 * yb_f + m22

    num_x = ax + ay                                # (thg, L) broadcast adds
    num_y = bx + by
    den = dx + dyc

    # Guard the horizon line (den -> 0): clamp denominator, approx reciprocal on
    # the otherwise-idle EUP slot + one Newton step, then clip coords to a
    # finite range (out-of-bounds samples are masked to zero below, matching
    # grid_sample zeros padding, and the exp argument stays bounded).
    den = jnp.where(jnp.abs(den) < 1e-8, 1e-8, den)
    r = pl.reciprocal(den, approx=True)
    r = r * (2.0 - den * r)                        # Newton refine: ~2^-24 rel err
    xs = jnp.clip(num_x * r, -2.0, fW + 1.0)
    ys = jnp.clip(num_y * r, -2.0, fH + 1.0)

    # x contribution: source is constant along W, so the bilinear-x term with
    # zeros padding collapses to the partition-of-unity ramp
    #   val_x = max(0, min(1, xs + 1, W - xs)).
    val_x = jnp.maximum(jnp.minimum(jnp.minimum(xs + 1.0, fW - xs), 1.0), 0.0)

    # y contribution: bilinear between integer rows y0 and y0+1, with source
    # value at row t equal to exp(-ps*t/H).  One exp per pixel; the y0+1
    # neighbor reuses e * exp(-ps/H) (scalar, precomputed per batch).
    y0 = jnp.floor(ys)
    wy1 = ys - y0
    wy0 = 1.0 - wy1
    e = jnp.exp(np_over_h * y0)                    # EUP; argument bounded by clip
    vy0 = jnp.where(jnp.logical_and(ys >= 0.0, ys < fH), wy0, 0.0)
    vy1 = jnp.where(jnp.logical_and(ys >= -1.0, ys < fH - 1.0), wy1, 0.0)
    val_y = e * (vy0 + c_step * vy1)

    out_ref[0, 0, :, :] = val_y * val_x


# ----------------------------------------------------------------------------
# Plain-JAX glue (parameter / matrix setup)
# ----------------------------------------------------------------------------
def _get_perspective_transform(points_src, points_dst):
    """Kornia-style 4-point DLT: returns M with points_dst = M @ points_src."""
    B = points_src.shape[0]
    x = points_src[..., 0]  # (B, 4)
    y = points_src[..., 1]
    u = points_dst[..., 0]
    v = points_dst[..., 1]
    zeros = jnp.zeros_like(x)
    ones = jnp.ones_like(x)
    rows_u = jnp.stack([x, y, ones, zeros, zeros, zeros, -x * u, -y * u], axis=-1)
    rows_v = jnp.stack([zeros, zeros, zeros, x, y, ones, -x * v, -y * v], axis=-1)
    A = jnp.concatenate([rows_u, rows_v], axis=1)          # (B, 8, 8)
    rhs = jnp.concatenate([u, v], axis=1)[..., None]       # (B, 8, 1)
    theta = jnp.linalg.solve(A, rhs)[..., 0]               # (B, 8)
    M = jnp.concatenate([theta, jnp.ones((B, 1), theta.dtype)], axis=-1)
    return M.reshape(B, 3, 3)


def parametric_homography(v_pts, thetas_l, thetas_r, alphas, im_shape):
    h, w = im_shape
    B = v_pts.shape[0]
    fh, fw = float(h), float(w)

    p_l = jnp.stack(
        [jnp.zeros((B,), jnp.float32),
         v_pts[:, 1] + v_pts[:, 0] * (1.0 / jnp.tan(thetas_l))], axis=-1)
    p_r = jnp.stack(
        [jnp.full((B,), fw - 1.0, jnp.float32),
         v_pts[:, 1] + (fw - 1.0 - v_pts[:, 0]) * (1.0 / jnp.tan(thetas_r))], axis=-1)

    a = alphas[:, None]
    p1 = a * p_l + (1.0 - a) * v_pts
    p2 = a * p_r + (1.0 - a) * v_pts
    c3 = jnp.tile(jnp.array([[fw - 1.0, fh - 1.0]], jnp.float32), (B, 1))
    c4 = jnp.tile(jnp.array([[0.0, fh - 1.0]], jnp.float32), (B, 1))
    pt_src = jnp.stack([p1, p2, c3, c4], axis=1)  # (B, 4, 2)

    pt_dst = jnp.tile(
        jnp.array([[[0.0, 0.0], [fw - 1.0, 0.0],
                    [fw - 1.0, fh - 1.0], [0.0, fh - 1.0]]], jnp.float32),
        (B, 1, 1))

    M = _get_perspective_transform(pt_dst, pt_src)  # maps pt_dst -> pt_src
    return pt_src, M


def _choose_row_fold(H, W):
    """Fold RL image rows into the lane axis so L = RL*W is a multiple of 128."""
    if W % 128 == 0:
        return 1
    rl_dense = 128 // math.gcd(W, 128)
    if H % rl_dense == 0:
        return rl_dense
    # Fallback (H not divisible by the dense fold): largest RL | H with RL*W <= 128.
    cand = max(1, 128 // W)
    while cand > 1 and H % cand != 0:
        cand -= 1
    return cand


def homography_layer_forward(imgs, v_pts, thetas_l, thetas_r, alphas, ps,
                             im_shape, return_homo=False):
    B = imgs.shape[0]
    H, W = im_shape

    pt_src, M = parametric_homography(
        v_pts.astype(jnp.float32), thetas_l.astype(jnp.float32),
        thetas_r.astype(jnp.float32), alphas.astype(jnp.float32), im_shape)

    # warp_perspective samples src at M^{-1} @ dst (pixel space, align_corners=True)
    M_inv = jnp.linalg.inv(M)
    minv_flat = M_inv.reshape(B, 9).astype(jnp.float32)
    ps_f = ps.reshape(B).astype(jnp.float32)
    np_over_h = -ps_f / float(H)
    c_step = jnp.exp(np_over_h)
    # Flat 1-D SMEM scalar operand: [m00..m22, -ps/H, exp(-ps/H)] per batch.
    params = jnp.concatenate(
        [minv_flat, np_over_h[:, None], c_step[:, None]], axis=1).reshape(B * 11)

    # Lane-dense output layout: fold RL image rows into the lane axis so the
    # block's last dim is a multiple of 128 whenever possible (unmasked stores).
    RL = _choose_row_fold(H, W)
    HG = H // RL          # row-groups (sublane axis of the pallas output)
    L = RL * W            # lanes per row-group

    # Sublane tile: ~1 MiB f32 per output block (the only DMA is the
    # double-buffered writeback, so VMEM cost is ~2 MiB -- comfortable on
    # v5e/v6e/v7x scoped defaults) to amortize per-grid-step overhead.
    max_elems = 256 * 1024
    max_rows = max(8, max_elems // L)
    if max_rows >= HG:
        THG = HG
    else:
        THG = max(8, (max_rows // 8) * 8)
    # v7x has 2 TensorCores: when B == 1, split the H axis so the grid has at
    # least 2 parallel steps (otherwise one core idles).
    if B == 1 and THG >= HG and HG >= 16:
        THG = max(8, (((HG + 1) // 2) // 8) * 8)
    nh = pl.cdiv(HG, THG)

    cost = pl.CostEstimate(
        flops=25 * B * H * W,
        transcendentals=2 * B * H * W,          # exp + approx reciprocal per pixel
        bytes_accessed=4 * B * H * W + 4 * B * 11,
    )

    grid_spec = pltpu.PrefetchScalarGridSpec(
        num_scalar_prefetch=1,
        grid=(B, nh),
        in_specs=[],
        out_specs=pl.BlockSpec((1, 1, THG, L), lambda b, g, params: (b, 0, g, 0)),
    )
    out_folded = pl.pallas_call(
        functools.partial(_warp_kernel, H=H, W=W, RL=RL),
        out_shape=jax.ShapeDtypeStruct((B, 1, HG, L), jnp.float32),
        grid_spec=grid_spec,
        compiler_params=pltpu.CompilerParams(
            dimension_semantics=("parallel", "parallel")),
        cost_estimate=cost,
    )(params)

    # Row-major unfold (free reshape): (B,1,H/RL,RL*W) -> (B,1,H,W).
    map_warp = out_folded.reshape(B, 1, H, W)

    if return_homo:
        return map_warp, (pt_src, M)
    return map_warp


# ----------------------------------------------------------------------------
# Demo
# ----------------------------------------------------------------------------
if __name__ == "__main__":
    key = jax.random.PRNGKey(0)
    B, C = 2, 4
    H, W = 16, 16
    im_shape = (H, W)

    k1, k2, k3, k4, k5, k6, k7 = jax.random.split(key, 7)
    imgs = jax.random.normal(k1, (B, C, H, W), jnp.float32)
    v_x = jax.random.uniform(k2, (B,), minval=0.3 * W, maxval=0.7 * W)
    v_y = jax.random.uniform(k3, (B,), minval=0.1 * H, maxval=0.3 * H)
    v_pts = jnp.stack([v_x, v_y], axis=-1)                       # (B, 2)
    thetas_l = jax.random.uniform(k4, (B,), minval=0.6, maxval=1.2)
    thetas_r = jax.random.uniform(k5, (B,), minval=0.6, maxval=1.2)
    alphas = jax.random.uniform(k6, (B,), minval=0.3, maxval=0.7)
    ps = jax.random.uniform(k7, (B,), minval=0.5, maxval=2.0)

    map_warp, (pt_src, M) = homography_layer_forward(
        imgs, v_pts, thetas_l, thetas_r, alphas, ps, im_shape, return_homo=True)
    jax.block_until_ready(map_warp)

    assert map_warp.shape == (B, 1, H, W)
    assert map_warp.dtype == jnp.float32
    assert bool(jnp.all(jnp.isfinite(map_warp)))
    print("KERNEL_OK")
</pallas_src>

<mosaic_0001>
module attributes {stable_mosaic.version = 11 : i64} {
  func.func @_warp_kernel(%arg0: i32, %arg1: i32, %arg2: memref<22xf32, #tpu.memory_space<smem>>, %arg3: memref<1x1x2x128xf32, #tpu.memory_space<vmem>>) attributes {dimension_semantics = [#tpu.dimension_semantics<parallel>, #tpu.dimension_semantics<parallel>], iteration_bounds = array<i64: 2, 1>, scalar_prefetch = 1 : i64, scratch_operands = 0 : i64, tpu.core_type = #tpu.core_type<tc>, window_params = [{transform_indices = @transform_0, window_bounds = array<i64: 1, 1, 2, 128>}]} {
    %c11_i32 = arith.constant 11 : i32
    %0 = arith.muli %arg0, %c11_i32 : i32
    %c0_i32 = arith.constant 0 : i32
    %1 = arith.addi %0, %c0_i32 : i32
    %2 = arith.index_cast %1 : i32 to index
    %3 = memref.load %arg2[%2] : memref<22xf32, #tpu.memory_space<smem>>
    %c1_i32 = arith.constant 1 : i32
    %4 = arith.addi %0, %c1_i32 : i32
    %5 = arith.index_cast %4 : i32 to index
    %6 = memref.load %arg2[%5] : memref<22xf32, #tpu.memory_space<smem>>
    %c2_i32 = arith.constant 2 : i32
    %7 = arith.addi %0, %c2_i32 : i32
    %8 = arith.index_cast %7 : i32 to index
    %9 = memref.load %arg2[%8] : memref<22xf32, #tpu.memory_space<smem>>
    %c3_i32 = arith.constant 3 : i32
    %10 = arith.addi %0, %c3_i32 : i32
    %11 = arith.index_cast %10 : i32 to index
    %12 = memref.load %arg2[%11] : memref<22xf32, #tpu.memory_space<smem>>
    %c4_i32 = arith.constant 4 : i32
    %13 = arith.addi %0, %c4_i32 : i32
    %14 = arith.index_cast %13 : i32 to index
    %15 = memref.load %arg2[%14] : memref<22xf32, #tpu.memory_space<smem>>
    %c5_i32 = arith.constant 5 : i32
    %16 = arith.addi %0, %c5_i32 : i32
    %17 = arith.index_cast %16 : i32 to index
    %18 = memref.load %arg2[%17] : memref<22xf32, #tpu.memory_space<smem>>
    %c6_i32 = arith.constant 6 : i32
    %19 = arith.addi %0, %c6_i32 : i32
    %20 = arith.index_cast %19 : i32 to index
    %21 = memref.load %arg2[%20] : memref<22xf32, #tpu.memory_space<smem>>
    %c7_i32 = arith.constant 7 : i32
    %22 = arith.addi %0, %c7_i32 : i32
    %23 = arith.index_cast %22 : i32 to index
    %24 = memref.load %arg2[%23] : memref<22xf32, #tpu.memory_space<smem>>
    %c8_i32 = arith.constant 8 : i32
    %25 = arith.addi %0, %c8_i32 : i32
    %26 = arith.index_cast %25 : i32 to index
    %27 = memref.load %arg2[%26] : memref<22xf32, #tpu.memory_space<smem>>
    %c9_i32 = arith.constant 9 : i32
    %28 = arith.addi %0, %c9_i32 : i32
    %29 = arith.index_cast %28 : i32 to index
    %30 = memref.load %arg2[%29] : memref<22xf32, #tpu.memory_space<smem>>
    %c10_i32 = arith.constant 10 : i32
    %31 = arith.addi %0, %c10_i32 : i32
    %32 = arith.index_cast %31 : i32 to index
    %33 = memref.load %arg2[%32] : memref<22xf32, #tpu.memory_space<smem>>
    %34 = tpu.iota {dimensions = array<i32: 1>} : vector<1x128xi32>
    %35 = arith.sitofp %34 : vector<1x128xi32> to vector<1x128xf32>
    %cst = arith.constant 1.600000e+01 : f32
    %36 = vector.broadcast %cst : f32 to vector<1x128xf32>
    %37 = arith.divf %35, %36 : vector<1x128xf32>
    %38 = math.floor %37 : vector<1x128xf32>
    %cst_0 = arith.constant 1.600000e+01 : f32
    %39 = vector.broadcast %cst_0 : f32 to vector<1x128xf32>
    %40 = arith.mulf %38, %39 : vector<1x128xf32>
    %41 = arith.subf %35, %40 : vector<1x128xf32>
    %42 = tpu.iota {dimensions = array<i32: 0>} : vector<2x1xi32>
    %c2_i32_1 = arith.constant 2 : i32
    %43 = arith.muli %arg1, %c2_i32_1 : i32
    %44 = vector.broadcast %43 : i32 to vector<2x1xi32>
    %45 = arith.addi %42, %44 : vector<2x1xi32>
    %46 = arith.sitofp %45 : vector<2x1xi32> to vector<2x1xf32>
    %cst_2 = arith.constant 8.000000e+00 : f32
    %47 = vector.broadcast %cst_2 : f32 to vector<2x1xf32>
    %48 = arith.mulf %46, %47 : vector<2x1xf32>
    %49 = vector.broadcast %3 : f32 to vector<1x128xf32>
    %50 = arith.mulf %49, %41 : vector<1x128xf32>
    %51 = vector.broadcast %6 : f32 to vector<1x128xf32>
    %52 = arith.mulf %51, %38 : vector<1x128xf32>
    %53 = arith.addf %50, %52 : vector<1x128xf32>
    %54 = vector.broadcast %12 : f32 to vector<1x128xf32>
    %55 = arith.mulf %54, %41 : vector<1x128xf32>
    %56 = vector.broadcast %15 : f32 to vector<1x128xf32>
    %57 = arith.mulf %56, %38 : vector<1x128xf32>
    %58 = arith.addf %55, %57 : vector<1x128xf32>
    %59 = vector.broadcast %21 : f32 to vector<1x128xf32>
    %60 = arith.mulf %59, %41 : vector<1x128xf32>
    %61 = vector.broadcast %24 : f32 to vector<1x128xf32>
    %62 = arith.mulf %61, %38 : vector<1x128xf32>
    %63 = arith.addf %60, %62 : vector<1x128xf32>
    %64 = vector.broadcast %6 : f32 to vector<2x1xf32>
    %65 = arith.mulf %64, %48 : vector<2x1xf32>
    %66 = vector.broadcast %9 : f32 to vector<2x1xf32>
    %67 = arith.addf %65, %66 : vector<2x1xf32>
    %68 = vector.broadcast %15 : f32 to vector<2x1xf32>
    %69 = arith.mulf %68, %48 : vector<2x1xf32>
    %70 = vector.broadcast %18 : f32 to vector<2x1xf32>
    %71 = arith.addf %69, %70 : vector<2x1xf32>
    %72 = vector.broadcast %24 : f32 to vector<2x1xf32>
    %73 = arith.mulf %72, %48 : vector<2x1xf32>
    %74 = vector.broadcast %27 : f32 to vector<2x1xf32>
    %75 = arith.addf %73, %74 : vector<2x1xf32>
    %76 = vector.broadcast %53 : vector<1x128xf32> to vector<2x128xf32>
    %77 = vector.broadcast %67 : vector<2x1xf32> to vector<2x128xf32>
    %78 = arith.addf %76, %77 : vector<2x128xf32>
    %79 = vector.broadcast %58 : vector<1x128xf32> to vector<2x128xf32>
    %80 = vector.broadcast %71 : vector<2x1xf32> to vector<2x128xf32>
    %81 = arith.addf %79, %80 : vector<2x128xf32>
    %82 = vector.broadcast %63 : vector<1x128xf32> to vector<2x128xf32>
    %83 = vector.broadcast %75 : vector<2x1xf32> to vector<2x128xf32>
    %84 = arith.addf %82, %83 : vector<2x128xf32>
    %85 = math.absf %84 : vector<2x128xf32>
    %cst_3 = arith.constant 9.99999993E-9 : f32
    %86 = vector.broadcast %cst_3 : f32 to vector<2x128xf32>
    %87 = arith.cmpf olt, %85, %86 : vector<2x128xf32>
    %cst_4 = arith.constant 9.99999993E-9 : f32
    %88 = vector.broadcast %cst_4 : f32 to vector<2x128xf32>
    %89 = arith.select %87, %88, %84 : vector<2x128xi1>, vector<2x128xf32>
    %90 = tpu.reciprocal %89 {approx = true} : vector<2x128xf32> -> vector<2x128xf32>
    %91 = arith.mulf %89, %90 : vector<2x128xf32>
    %cst_5 = arith.constant 2.000000e+00 : f32
    %92 = vector.broadcast %cst_5 : f32 to vector<2x128xf32>
    %93 = arith.subf %92, %91 : vector<2x128xf32>
    %94 = arith.mulf %90, %93 : vector<2x128xf32>
    %95 = arith.mulf %78, %94 : vector<2x128xf32>
    %cst_6 = arith.constant -2.000000e+00 : f32
    %cst_7 = arith.constant 1.700000e+01 : f32
    %96 = vector.broadcast %cst_6 : f32 to vector<2x128xf32>
    %97 = arith.maximumf %96, %95 : vector<2x128xf32>
    %98 = vector.broadcast %cst_7 : f32 to vector<2x128xf32>
    %99 = arith.minimumf %98, %97 : vector<2x128xf32>
    %100 = arith.mulf %81, %94 : vector<2x128xf32>
    %cst_8 = arith.constant -2.000000e+00 : f32
    %cst_9 = arith.constant 1.700000e+01 : f32
    %101 = vector.broadcast %cst_8 : f32 to vector<2x128xf32>
    %102 = arith.maximumf %101, %100 : vector<2x128xf32>
    %103 = vector.broadcast %cst_9 : f32 to vector<2x128xf32>
    %104 = arith.minimumf %103, %102 : vector<2x128xf32>
    %cst_10 = arith.constant 1.000000e+00 : f32
    %105 = vector.broadcast %cst_10 : f32 to vector<2x128xf32>
    %106 = arith.addf %99, %105 : vector<2x128xf32>
    %cst_11 = arith.constant 1.600000e+01 : f32
    %107 = vector.broadcast %cst_11 : f32 to vector<2x128xf32>
    %108 = arith.subf %107, %99 : vector<2x128xf32>
    %109 = arith.minimumf %106, %108 : vector<2x128xf32>
    %cst_12 = arith.constant 1.000000e+00 : f32
    %110 = vector.broadcast %cst_12 : f32 to vector<2x128xf32>
    %111 = arith.minimumf %109, %110 : vector<2x128xf32>
    %cst_13 = arith.constant 0.000000e+00 : f32
    %112 = vector.broadcast %cst_13 : f32 to vector<2x128xf32>
    %113 = arith.maximumf %111, %112 : vector<2x128xf32>
    %114 = math.floor %104 : vector<2x128xf32>
    %115 = arith.subf %104, %114 : vector<2x128xf32>
    %cst_14 = arith.constant 1.000000e+00 : f32
    %116 = vector.broadcast %cst_14 : f32 to vector<2x128xf32>
    %117 = arith.subf %116, %115 : vector<2x128xf32>
    %118 = vector.broadcast %30 : f32 to vector<2x128xf32>
    %119 = arith.mulf %118, %114 : vector<2x128xf32>
    %120 = math.exp %119 : vector<2x128xf32>
    %cst_15 = arith.constant 0.000000e+00 : f32
    %121 = vector.broadcast %cst_15 : f32 to vector<2x128xf32>
    %122 = arith.cmpf oge, %104, %121 : vector<2x128xf32>
    %cst_16 = arith.constant 1.600000e+01 : f32
    %123 = vector.broadcast %cst_16 : f32 to vector<2x128xf32>
    %124 = arith.cmpf olt, %104, %123 : vector<2x128xf32>
    %125 = arith.andi %122, %124 : vector<2x128xi1>
    %cst_17 = arith.constant 0.000000e+00 : f32
    %126 = vector.broadcast %cst_17 : f32 to vector<2x128xf32>
    %127 = arith.select %125, %117, %126 : vector<2x128xi1>, vector<2x128xf32>
    %cst_18 = arith.constant -1.000000e+00 : f32
    %128 = vector.broadcast %cst_18 : f32 to vector<2x128xf32>
    %129 = arith.cmpf oge, %104, %128 : vector<2x128xf32>
    %cst_19 = arith.constant 1.500000e+01 : f32
    %130 = vector.broadcast %cst_19 : f32 to vector<2x128xf32>
    %131 = arith.cmpf olt, %104, %130 : vector<2x128xf32>
    %132 = arith.andi %129, %131 : vector<2x128xi1>
    %cst_20 = arith.constant 0.000000e+00 : f32
    %133 = vector.broadcast %cst_20 : f32 to vector<2x128xf32>
    %134 = arith.select %132, %115, %133 : vector<2x128xi1>, vector<2x128xf32>
    %135 = vector.broadcast %33 : f32 to vector<2x128xf32>
    %136 = arith.mulf %135, %134 : vector<2x128xf32>
    %137 = arith.addf %127, %136 : vector<2x128xf32>
    %138 = arith.mulf %120, %137 : vector<2x128xf32>
    %139 = arith.mulf %138, %113 : vector<2x128xf32>
    %c0 = arith.constant 0 : index
    %c0_21 = arith.constant 0 : index
    %c0_22 = arith.constant 0 : index
    %c0_23 = arith.constant 0 : index
    %140 = vector.load %arg3[%c0, %c0_21, %c0_22, %c0_23] : memref<1x1x2x128xf32, #tpu.memory_space<vmem>>, vector<1x1x2x128xf32>
    %141 = vector.shape_cast %140 : vector<1x1x2x128xf32> to vector<2x128xf32>
    %142 = vector.shape_cast %139 : vector<2x128xf32> to vector<1x1x2x128xf32>
    tpu.vector_store %arg3[%c0, %c0_21, %c0_22, %c0_23], %142 {strides = array<i32>} : memref<1x1x2x128xf32, #tpu.memory_space<vmem>>, vector<1x1x2x128xf32>,
    return
  }
  func.func @transform_0(%arg0: i32, %arg1: i32, %arg2: memref<22xf32, #tpu.memory_space<smem>>) -> (i32, i32, i32, i32) {
    %c0_i32 = arith.constant 0 : i32
    %c0_i32_0 = arith.constant 0 : i32
    %c0_i32_1 = arith.constant 0 : i32
    return %arg0, %c0_i32, %arg1, %c0_i32_0 : i32, i32, i32, i32
  }
}

</mosaic_0001>

<bundles_post_ra>
// kernel: tpu_custom_call.1
= control target key start
LH: loop header
LB: loop body
LE: loop exit
PB: predicated region body
PF: predicated region fallthrough
CT: control target
= control target key end

     0   :  { %s482_s0 = inlined_call_operand.hbm [shape: f32[22], index: 0, kind: input, shape index: {}]   ;;  %s483_s1 = inlined_call_operand.hbm [shape: f32[2,1,2,128], index: 1, kind: output, shape index: {}]  }
   0x1   :  { %s280_s8 = scalar_lea.hbm %s482_s0, 16 }
   0x2   :  { %p281_p0 = scmp.ne.s32.totalorder %s482_s0, %s280_s8  ;;  %p284_p1 = scmp.lt.u32.totalorder %s280_s8, %s482_s0 }
   0x4   :  { %p286_p2 = pnand %p284_p1, %p281_p0 }
   0x6   :  { %289 = shalt.err (!%p286_p2)  }
   0x7   :  { %s356_s13 = smov [#allocation3]  }
   0x8   :  { %7 = dma.hbm_to_smem %s482_s0, 16, %s356_s13, [#allocation2] }
   0x9   :  { %334 = dma.done.wait [#allocation2], 16 }
   0xa   :  { %335 = vsyncadd [#allocation2], 4294967280 }
   0xb   :  { %9 = sfence }
   0xc   :  { %10 = vsyncpa [#allocation5], 0 }
   0xd   :  { %12 = vsyncpa [#allocation5 + $0x1], 0  ;;  %s380_s16 = smov 0   ;;  %s382_s17 = smov 0  }
   0xe   :  { %s384_s18 = smov 0   ;;  %s386_s19 = smov 0  }
   0xf LB: > { %s27_s0 = sadd.s32 1, %s350_s18  ;;  %s228_s20 = sadd.s32 4294967295, %s354_s19   ;;  %s354_s19 = sphi %s386_s19, %s18_s19   ;;  %s350_s18 = sphi %s384_s18, %s488_s18   ;;  %s346_s17 = sphi %s382_s17, %s487_s17   ;;  %s342_s16 = sphi %s380_s16, %s486_s16  }
  0x10   : > { %p29_p3 = scmp.ge.s32.totalorder %s27_s0, 2  ;;  %p45_p4 = scmp.ne.s32.totalorder %s346_s17, %s342_s16 }
  0x11   : > { %s36_s21 = sadd.s32 1, %s346_s17  ;;  %p46_p5 = scmp.eq.s32.totalorder %s228_s20, 1 }
  0x12   : > { %s490_s0 = smov (%p29_p3, %s27_s0), 0  ;;  %p40_p6 = scmp.eq.s32.totalorder %s354_s19, 1 }
  0x13   : > { %s31_s22 = ssub.s32 %s350_s18, %s490_s0  ;;  %p410_p9 = por %p46_p5, %p45_p4 }
  0x14   : > { %p34_p7 = scmp.eq.s32.totalorder %s31_s22, 0  ;;  %p229_p8 = scmp.ne.s32.totalorder %s31_s22, 0 }
  0x15   : > { %p230_p11 = scmp.ge.s32.totalorder %s354_s19, 2 }
  0x16   : > { %s415_s24 = scalar_select %p34_p7, %s346_s17, %s36_s21  }
  0x17   : > { %p417_p10 = por %p229_p8, %p40_p6  ;;  %55 = sbr.rel (%p230_p11) target bundleno = 105 (0x69), region = 12  ;;  %v85_v0 = vlaneseq (!%p230_p11) }
  0x18   : > { %s423_s26 = smul.u32 (!%p230_p11), 11, %s350_s18 }
  0x19   : > { %v86_v1 = vand.u32 (!%p230_p11), 127, %v85_v0  ;;  %v94_v3 = vshrl.u32 (!%p230_p11), %v85_v0, 7 }
  0x1a   : > { %s75_s27 = sadd.s32 (!%p230_p11), 6, %s423_s26  ;;  %s77_s29 = sadd.s32 (!%p230_p11), 7, %s423_s26 }
  0x1b   : > { %v87_v2 = vcvt.s32.f32 (!%p230_p11), %v86_v1  ;;  %s76_s28 = sld [smem:[#allocation3 + %s75_s27]] (!%p230_p11)  ;;  %s79_s30 = sadd.s32 (!%p230_p11), 8, %s423_s26  ;;  %v98_v6 = vcvt.s32.f32 (!%p230_p11), %v94_v3 }
  0x1c   : > { %s78_s2 = sld [smem:[#allocation3 + %s77_s29]] (!%p230_p11)  ;;  %s65_s4 = sadd.s32 (!%p230_p11), 1, %s423_s26 }
  0x1d   : > { %v89_v4 = vmul.f32 (!%p230_p11), 0.0625, %v87_v2  ;;  %s80_s3 = sld [smem:[#allocation3 + %s79_s30]] (!%p230_p11)  ;;  %v99_v9 = vmul.f32 (!%p230_p11), 8.0, %v98_v6  ;;  %s69_s5 = sadd.s32 (!%p230_p11), 3, %s423_s26 }
  0x1e   : > { %s71_s6 = sadd.s32 4, %s423_s26  ;;  %s64_s7 = sld [smem:[#allocation3 + %s423_s26]] }
  0x1f   : > { %v90_v5 = vfloor.f32 %v89_v4  ;;  %s66_s8 = sld [smem:[#allocation3 + %s65_s4]]  ;;  %s67_s11 = sadd.s32 2, %s423_s26 }
  0x20   : > { %s70_s9 = sld [smem:[#allocation3 + %s69_s5]]  ;;  %s73_s12 = sadd.s32 5, %s423_s26 }
  0x21   : > { %v91_v7 = vmul.f32 16.0, %v90_v5  ;;  %v110_v10 = vstv %s76_s28  ;;  %s72_s10 = sld [smem:[#allocation3 + %s71_s6]]  ;;  %s81_s15 = sadd.s32 9, %s423_s26 }
  0x22   : > { %v112_v12 = vstv %s78_s2  ;;  %s68_s13 = sld [smem:[#allocation3 + %s67_s11]]  ;;  %s83_s21 = sadd.s32 10, %s423_s26 }
  0x23   : > { %v92_v8 = vsub.f32 %v87_v2, %v91_v7  ;;  %v122_v13 = vstv %s80_s3  ;;  %v113_v14 = vmul.f32 %v112_v12, %v90_v5  ;;  %v121_v15 = vmul.f32 %v112_v12, %v99_v9  ;;  %s74_s14 = sld [smem:[#allocation3 + %s73_s12]]  ;;  %s60_s26 = sand.u32 1, %s346_s17  }
  0x24   : > { %v100_v22 = vstv %s64_s7  ;;  %s82_s20 = sld [smem:[#allocation3 + %s81_s15]]  ;;  %s231_s27 = sshll.u32 %s60_s26, 1 }
  0x25   : > { %v111_v11 = vmul.f32 %v110_v10, %v92_v8  ;;  %v123_v17 = vadd.f32 %v122_v13, %v121_v15  ;;  %v102_v21 = vstv %s66_s8  ;;  %v101_v27 = vmul.f32 %v100_v22, %v92_v8  ;;  %s84_s22 = sld [smem:[#allocation3 + %s83_s21]]  ;;  %s62_s28 = scalar_lea.vmem [#allocation4], %s231_s27 }
  0x26   : > { %v105_v23 = vstv %s70_s9  ;;  %v103_v25 = vmul.f32 %v102_v21, %v90_v5  ;;  %v115_v26 = vmul.f32 %v102_v21, %v99_v9  ;;  %s181_s29 = sshll.u32 %s62_s28, 4  ;;  %s233_s30 = sshll.u32 %s350_s18, 5  ;;  %s438_s29 = int_to_ptr.vmem [resolvable:$true] %s181_s29 }
  0x27   : > { %v114_v16 = vadd.f32 %v113_v14, %v111_v11  ;;  %v107_v24 = vstv %s72_s10  ;;  %v106_v28 = vmul.f32 %v105_v23, %v92_v8  ;;  %s443_s4 = scalar_lea.hbm %s483_s1, %s233_s30  ;;  %s167_s5 = scalar_lea.sflag [#allocation5], %s60_s26 }
  0x28   : > { %v108_v29 = vmul.f32 %v107_v24, %v90_v5  ;;  %v118_v30 = vmul.f32 %v107_v24, %v99_v9  ;;  %v116_v31 = vstv %s68_s13  ;;  %v104_v33 = vadd.f32 %v103_v25, %v101_v27  ;;  %s290_s6 = scalar_lea.vmem %s438_s29, 32  ;;  %s357_s18 = smov [#allocation4]  }
  0x29   : > { %v126_v18 = vadd.f32 %v123_v17, %v114_v16  ;;  %v119_v32 = vstv %s74_s14  ;;  %v117_v35 = vadd.f32 %v116_v31, %v115_v26  ;;  %p291_p12 = scmp.ne.s32.totalorder %s438_s29, %s290_s6  ;;  %s294_s7 = sshll.u32 %s357_s18, 4  ;;  %s295_s7 = int_to_ptr.vmem [resolvable:$false] %s294_s7 }
  0x2a   : > { %v109_v34 = vadd.f32 %v108_v29, %v106_v28  ;;  %v120_v36 = vadd.f32 %v119_v32, %v118_v30  ;;  %v148_v49 = vstv %s82_s20  ;;  %s296_s8 = scalar_lea.vmem %s295_s7, 64  ;;  %p297_p1 = scmp.lt.s32.totalorder %s438_s29, %s295_s7 }
  0x2b   : > { %v127_v19 = vand.u32 2147483647, %v126_v18  ;;  %v124_v39 = vadd.f32 %v117_v35, %v104_v33  ;;  %v160_v58 = vstv %s84_s22  ;;  %p292_p13 = pnand %p291_p12, %p417_p10  ;;  %p298_p2 = scmp.lt.s32.totalorder %s296_s8, %s290_s6 }
  0x2c   : > { %v125_v40 = vadd.f32 %v120_v36, %v109_v34 }
  0x2d   : > { %vm128_vm0 = vcmp.lt.f32.partialorder %v127_v19, 1e-08  ;;  %p293_p0 = pneg %p292_p13  ;;  %p299_p3 = por %p298_p2, %p297_p1 }
  0x2e   : > { %v129_v20 = vsel %vm128_vm0, 1e-08, %v126_v18 }
  0x2f   : > { %276 = vrcp.f32 %v129_v20  ;;  %p300_p4 = pnand %p299_p3, %p293_p0 }
  0x39   : > { %v277_v37 = vpop.eup %276 }
  0x3a   : > { %v131_v38 = vmul.f32 %v277_v37, %v129_v20 }
  0x3c   : > { %v132_v41 = vsub.f32 2.0, %v131_v38 }
  0x3e   : > { %v133_v42 = vmul.f32 %v277_v37, %v132_v41 }
  0x40   : > { %v134_v43 = vmul.f32 %v133_v42, %v124_v39  ;;  %v137_v44 = vmul.f32 %v133_v42, %v125_v40 }
  0x42   : > { %v135_v45 = vmax.f32 %v134_v43, -2.0  ;;  %v138_v46 = vmax.f32 %v137_v44, -2.0 }
  0x44   : > { %v139_v47 = vmin.f32 %v138_v46, 17.0  ;;  %v136_v48 = vmin.f32 %v135_v45, 17.0 }
  0x46   : > { %v145_v50 = vfloor.f32 %v139_v47  ;;  %vm156_vm1 = vcmp.ge.f32.partialorder %v139_v47, -1.0  ;;  %vm157_vm2 = vcmp.lt.f32.partialorder %v139_v47, 15.0  ;;  %v140_v53 = vadd.f32 1.0, %v136_v48 }
  0x47   : > { %v141_v54 = vsub.f32 16.0, %v136_v48  ;;  %vm158_vm3 = vmand %vm156_vm1, %vm157_vm2  ;;  %vm152_vm4 = vcmp.ge.f32.partialorder %v139_v47, 0.0  ;;  %vm153_vm5 = vcmp.lt.f32.partialorder %v139_v47, 16.0 }
  0x48   : > { %v146_v51 = vsub.f32 %v139_v47, %v145_v50  ;;  %v149_v52 = vmul.f32 %v148_v49, %v145_v50  ;;  %vm154_vm6 = vmand %vm152_vm4, %vm153_vm5 }
  0x49   : > { %v142_v59 = vmin.f32 %v140_v53, %v141_v54 }
  0x4a   : > { %v150_v55 = vmul.f32 1.442695, %v149_v52  ;;  %v147_v56 = vsub.f32 1.0, %v146_v51  ;;  %v159_v57 = vsel %vm158_vm3, %v146_v51, 0.0 }
  0x4b   : > { %v161_v60 = vmul.f32 %v160_v58, %v159_v57  ;;  %v143_v62 = vmin.f32 %v142_v59, 1.0 }
  0x4c   : > { %278 = vpow2.f32 %v150_v55  ;;  %v155_v61 = vsel %vm154_vm6, %v147_v56, 0.0 }
  0x4d   : > { %v162_v63 = vadd.f32 %v161_v60, %v155_v61  ;;  %v144_v0 = vmax.f32 %v143_v62, 0.0 }
  0x56   : > { %v279_v1 = vpop.eup %278 }
  0x57   : > { %v163_v2 = vmul.f32 %v279_v1, %v162_v63 }
  0x59   : > { %v164_v3 = vmul.f32 %v163_v2, %v144_v0 }
  0x5b   : > { %165 = vst [vmem:[%s62_s28] sm:$0x3] %v164_v3 }
  0x5c   : > { %303 = shalt.err (!%p300_p4)
}
  0x5d   : > { %s304_s9 = scalar_lea.hbm %s443_s4, 32  ;;  %s308_s12 = scalar_lea.hbm %s483_s1, 64 }
  0x5e   : > { %p305_p5 = scmp.ne.s32.totalorder %s443_s4, %s304_s9  ;;  %p309_p8 = scmp.lt.u32.totalorder %s443_s4, %s483_s1 }
  0x5f   : > { %p310_p11 = scmp.lt.u32.totalorder %s308_s12, %s304_s9  ;;  %p312_p13 = scmp.lt.u32.totalorder %s304_s9, %s443_s4 }
  0x60   : > { %p306_p6 = pnand %p305_p5, %p417_p10 }
  0x61   : > { %p311_p12 = por %p310_p11, %p309_p8 }
  0x62   : > { %p307_p7 = pneg %p306_p6 }
  0x63   : > { %p313_p0 = por %p312_p13, %p311_p12 }
  0x65   : > { %p314_p1 = pnand %p313_p0, %p307_p7 }
  0x67   : > { %317 = shalt.err (!%p314_p1)
}
  0x68   : > { %236 = dma.vmem_to_hbm [thread:$0]  (%p417_p10), %s438_s29, 32, %s443_s4, %s167_s5  }
  0x69 PF: > { %p242_p2 = scmp.ge.s32.totalorder %s354_s19, 1  ;;  %s193_s15 = sand.u32 1, %s342_s16  }
  0x6a   : > { %s194_s20 = scalar_lea.sflag [#allocation5], %s193_s15 }
  0x6b   : > { %p239_p3 = pnand %p242_p2, %p410_p9 }
  0x6d   : > { %337 = dma.done.wait (!%p239_p3), %s194_s20, 32  }
  0x6e   : > { %339 = vsyncadd (!%p239_p3), %s194_s20, 4294967264  ;;  %s18_s19 = sadd.s32 1, %s354_s19   ;;  %s486_s16 = smov %s346_s17 }
  0x6f   : > { %p15_p4 = scmp.ge.s32.totalorder %s18_s19, 3   ;;  %s487_s17 = smov %s415_s24 }
  0x70   : > { %s488_s18 = smov %s490_s0 }
  0x71   :  { %17 = sbr.rel (!%p15_p4) target bundleno = 15 (0xf), region = 44 }
  0x78   :  { %199 = vsyncpa [#allocation5], 1 }
  0x79   :  { %201 = vsyncpa [#allocation5 + $0x1], 1 }

</bundles_post_ra>
